<compile_context>
chip_gen: v5e
topology: v5e:2x2
jax: 0.10.0
libtpu: 0.0.40
codegen_flags: <defaults>
</compile_context>

<pallas_src>
import functools

import jax
import jax.numpy as jnp
from jax.experimental import pallas as pl
from jax.experimental.pallas import tpu as pltpu

_LANES = 128


def _round_up(x, m):
    return ((x + m - 1) // m) * m


def _jointv_kernel(x_ref, w_ref, b_ref, o_ref, acc_ref, *,
                   n_valid, tb, rows_w1, off_w2, off_w3, masked):
    s = pl.program_id(0)           # parallel shard (megacore on v7x)
    i = pl.program_id(1)           # reduction step within the shard
    n_inner = pl.num_programs(1)

    @pl.when(i == 0)
    def _init():
        acc_ref[...] = jnp.zeros_like(acc_ref)

    x = x_ref[...]                                     # (tb, f_pad) bf16

    # Static, 8-row-aligned, full-128-lane views into the packed buffers.
    w1 = w_ref[pl.ds(0, rows_w1), :]                   # (f_pad, 128) bf16
    w2 = w_ref[pl.ds(off_w2, _LANES), :]               # (128, 128)  bf16
    w3 = w_ref[pl.ds(off_w3, _LANES), :]               # (128, 128)  bf16
    b1 = b_ref[pl.ds(0, 1), :]                         # (1, 128) f32
    b2 = b_ref[pl.ds(1, 1), :]                         # (1, 128) f32
    b3 = b_ref[pl.ds(2, 1), :]                         # (1, 128) f32

    # bf16 MXU operands; f32 accumulation, bias add and ReLU.
    h1 = jnp.maximum(
        jnp.dot(x, w1, preferred_element_type=jnp.float32) + b1, 0.0)
    h2 = jnp.maximum(
        jnp.dot(h1.astype(jnp.bfloat16), w2,
                preferred_element_type=jnp.float32) + b2, 0.0)
    v = jnp.maximum(
        jnp.dot(h2.astype(jnp.bfloat16), w3,
                preferred_element_type=jnp.float32) + b3, 0.0)

    if masked:
        t = s * n_inner + i                            # global tile index
        has_pad = (t + 1) * tb > n_valid               # tile holds pad rows?

        @pl.when(has_pad)
        def _acc_masked():
            rows = jax.lax.broadcasted_iota(jnp.int32, v.shape, 0) + t * tb
            vm = jnp.where(rows < n_valid, v, 0.0)
            acc_ref[...] += jnp.sum(vm, axis=0, keepdims=True)

        @pl.when(jnp.logical_not(has_pad))
        def _acc_full():
            acc_ref[...] += jnp.sum(v, axis=0, keepdims=True)
    else:
        acc_ref[...] += jnp.sum(v, axis=0, keepdims=True)

    @pl.when(i == n_inner - 1)
    def _finalize():
        # Per-shard partial sum through SMEM (cheap scalar store path).
        o_ref[0, 0] = jnp.sum(acc_ref[...])


def pack_params(params, f_pad):
    """Pack weights into one lane-dense bf16 buffer + one f32 bias buffer.

    w1 -> rows [0, f_pad)      x (128 lanes), cols 0..H-1 valid
    w2 -> rows [f_pad, +128)   x (128 lanes), rows 0..H-1 / cols 0..F-1 valid
    w3 -> rows [f_pad+128,+128)x (128 lanes), rows 0..F-1 / cols 0..A-1 valid
    Biases live in a tiny (8, 128) f32 buffer (rows 0/1/2).
    All padding is zero, so extra lanes produce ReLU(0)=0 and never pollute
    the global sum.
    """
    w1, b1, w2, b2, w3, b3 = [jnp.asarray(p, jnp.float32) for p in params]
    F, H = w1.shape
    A = w3.shape[1]
    rows_w1 = f_pad
    off_w2 = rows_w1
    off_w3 = rows_w1 + _LANES
    total = rows_w1 + 2 * _LANES

    wbuf = jnp.zeros((total, _LANES), jnp.float32)
    wbuf = wbuf.at[:F, :H].set(w1)
    wbuf = wbuf.at[off_w2:off_w2 + H, :F].set(w2)
    wbuf = wbuf.at[off_w3:off_w3 + F, :A].set(w3)

    bbuf = jnp.zeros((8, _LANES), jnp.float32)
    bbuf = bbuf.at[0, :H].set(b1.reshape(-1))
    bbuf = bbuf.at[1, :F].set(b2.reshape(-1))
    bbuf = bbuf.at[2, :A].set(b3.reshape(-1))

    return wbuf.astype(jnp.bfloat16), bbuf, rows_w1, off_w2, off_w3


def jointv_forward(x, params, *, block_rows=1024, num_shards=2):
    B, F = x.shape
    A = params[4].shape[1]
    f_pad = _round_up(F, 8)

    wbuf, bbuf, rows_w1, off_w2, off_w3 = pack_params(params, f_pad)

    # Batch tiling: large tiles to amortize the ~0.35us per-grid-step cost.
    b8 = _round_up(B, 8)
    tb = min(_round_up(block_rows, 8), b8)
    n_tiles = -(-b8 // tb)
    n_shards = max(1, min(num_shards, n_tiles))
    n_tiles = _round_up(n_tiles, n_shards)      # balance shards
    nb_per = n_tiles // n_shards
    b_pad = n_tiles * tb

    xk = x.astype(jnp.bfloat16)
    if b_pad != B or f_pad != F:
        xk = jnp.pad(xk, ((0, b_pad - B), (0, f_pad - F)))
    masked = (b_pad != B)

    kernel = functools.partial(
        _jointv_kernel,
        n_valid=B, tb=tb, rows_w1=rows_w1,
        off_w2=off_w2, off_w3=off_w3, masked=masked)

    flops = 2 * b_pad * (f_pad * _LANES + _LANES * _LANES + _LANES * _LANES)
    bytes_accessed = xk.size * 2 + wbuf.size * 2 + bbuf.size * 4 + n_shards * 4

    partials = pl.pallas_call(
        kernel,
        out_shape=jax.ShapeDtypeStruct((n_shards, 1), jnp.float32),
        grid_spec=pltpu.PrefetchScalarGridSpec(
            num_scalar_prefetch=0,
            grid=(n_shards, nb_per),
            in_specs=[
                # batch tile marches over both grid axes (contiguous per shard)
                pl.BlockSpec((tb, f_pad), lambda s, i: (s * nb_per + i, 0)),
                # packed weights: constant index -> fetched once, resident
                pl.BlockSpec(wbuf.shape, lambda s, i: (0, 0)),
                # packed f32 biases: constant index -> resident
                pl.BlockSpec(bbuf.shape, lambda s, i: (0, 0)),
            ],
            # per-shard scalar partial sums through SMEM
            out_specs=pl.BlockSpec((1, 1), lambda s, i: (s, 0),
                                   memory_space=pltpu.MemorySpace.SMEM),
            scratch_shapes=[pltpu.VMEM((1, _LANES), jnp.float32)],
        ),
        compiler_params=pltpu.CompilerParams(
            # shard axis parallel (dual-TC on v7x); accumulator axis arbitrary
            dimension_semantics=("parallel", "arbitrary"),
        ),
        cost_estimate=pl.CostEstimate(
            flops=flops, transcendentals=0, bytes_accessed=bytes_accessed),
    )(xk, wbuf, bbuf)

    return jnp.sum(partials) / jnp.float32(B * A)


def init_params(key, features_n=64, agents_n=4):
    """Deterministic init mimicking nn.Linear default U(-1/sqrt(fan_in), +)."""
    def linear(k, fan_in, fan_out):
        kw, kb = jax.random.split(k)
        bound = 1.0 / jnp.sqrt(jnp.float32(fan_in))
        # stored as (in, out) so the kernel does x @ W  (== PyTorch x @ W.T)
        w = jax.random.uniform(kw, (fan_in, fan_out), jnp.float32, -bound, bound)
        b = jax.random.uniform(kb, (1, fan_out), jnp.float32, -bound, bound)
        return w, b

    k1, k2, k3 = jax.random.split(key, 3)
    w1, b1 = linear(k1, features_n, features_n // 2)
    w2, b2 = linear(k2, features_n // 2, features_n)
    w3, b3 = linear(k3, features_n, agents_n)
    return (w1, b1, w2, b2, w3, b3)


def jointv_reference(x, params):
    w1, b1, w2, b2, w3, b3 = params
    h1 = jnp.maximum(x @ w1 + b1, 0.0)
    h2 = jnp.maximum(h1 @ w2 + b2, 0.0)
    v = jnp.maximum(h2 @ w3 + b3, 0.0)
    return jnp.mean(v)


if __name__ == "__main__":
    features_n, agents_n = 64, 4

    key = jax.random.PRNGKey(0)
    kx1, kx2, kp = jax.random.split(key, 3)
    params = init_params(kp, features_n, agents_n)

    # bf16 MXU operands -> compare against the f32 reference with a modest
    # tolerance; the global mean averages the per-element rounding error away.
    ATOL, RTOL = 5e-3, 2e-2

    # Case 1: small batch (single tile, single shard, no padding mask).
    x_small = jax.random.normal(kx1, (8, features_n), jnp.float32)
    out_small = jax.block_until_ready(jointv_forward(x_small, params))
    ref_small = jointv_reference(x_small, params)
    assert jnp.allclose(out_small, ref_small, atol=ATOL, rtol=RTOL), (
        out_small, ref_small)

    # Case 2: batch not a multiple of 8 (single big tile + padded-row mask).
    x_big = jax.random.normal(kx2, (300, features_n), jnp.float32)
    out_big = jax.block_until_ready(jointv_forward(x_big, params))
    ref_big = jointv_reference(x_big, params)
    assert jnp.allclose(out_big, ref_big, atol=ATOL, rtol=RTOL), (
        out_big, ref_big)

    # Case 3: force the multi-tile, dual-shard ("parallel","arbitrary") path
    # (128-row tiles, shard balancing adds a fully-padded tile that must be
    # masked to zero).
    out_shard = jax.block_until_ready(
        jointv_forward(x_big, params, block_rows=128, num_shards=2))
    assert jnp.allclose(out_shard, ref_big, atol=ATOL, rtol=RTOL), (
        out_shard, ref_big)

    print("KERNEL_OK")
</pallas_src>

<mosaic_0001>
module attributes {stable_mosaic.version = 11 : i64} {
  func.func @_jointv_kernel(%arg0: i32, %arg1: i32, %arg2: memref<8x64xbf16, #tpu.memory_space<vmem>>, %arg3: memref<320x128xbf16, #tpu.memory_space<vmem>>, %arg4: memref<8x128xf32, #tpu.memory_space<vmem>>, %arg5: memref<1x1xf32, #tpu.memory_space<smem>>, %arg6: memref<1x128xf32, #tpu.memory_space<vmem>>) attributes {dimension_semantics = [#tpu.dimension_semantics<parallel>, #tpu.dimension_semantics<arbitrary>], iteration_bounds = array<i64: 1, 1>, scalar_prefetch = 0 : i64, scratch_operands = 1 : i64, tpu.core_type = #tpu.core_type<tc>, window_params = [{transform_indices = @transform_0, window_bounds = array<i64: 8, 64>}, {pipeline_mode = #tpu.pipeline_mode<synchronous>, transform_indices = @transform_1, window_bounds = array<i64: 320, 128>}, {pipeline_mode = #tpu.pipeline_mode<synchronous>, transform_indices = @transform_2, window_bounds = array<i64: 8, 128>}, {transform_indices = @transform_3, window_bounds = array<i64: 1, 1>}]} {
    %c0_i32 = arith.constant 0 : i32
    %0 = arith.cmpi eq, %arg1, %c0_i32 : i32
    %1 = arith.extui %0 : i1 to i32
    %c0_i32_0 = arith.constant 0 : i32
    %2 = arith.cmpi ne, %1, %c0_i32_0 : i32
    scf.if %2 {
      %cst_22 = arith.constant 0.000000e+00 : f32
      %35 = vector.broadcast %cst_22 : f32 to vector<1x128xf32>
      %c0_23 = arith.constant 0 : index
      %c0_24 = arith.constant 0 : index
      %36 = vector.load %arg6[%c0_23, %c0_24] : memref<1x128xf32, #tpu.memory_space<vmem>>, vector<1x128xf32>
      tpu.vector_store %arg6[%c0_23, %c0_24], %35 {strides = array<i32>} : memref<1x128xf32, #tpu.memory_space<vmem>>, vector<1x128xf32>,
    } else {
    }
    %c0 = arith.constant 0 : index
    %c0_1 = arith.constant 0 : index
    %3 = vector.load %arg2[%c0, %c0_1] : memref<8x64xbf16, #tpu.memory_space<vmem>>, vector<8x64xbf16>
    %c0_2 = arith.constant 0 : index
    %c0_3 = arith.constant 0 : index
    %4 = vector.load %arg3[%c0_2, %c0_3] : memref<320x128xbf16, #tpu.memory_space<vmem>>, vector<64x128xbf16>
    %c64 = arith.constant 64 : index
    %c0_4 = arith.constant 0 : index
    %5 = vector.load %arg3[%c64, %c0_4] : memref<320x128xbf16, #tpu.memory_space<vmem>>, vector<128x128xbf16>
    %c192 = arith.constant 192 : index
    %c0_5 = arith.constant 0 : index
    %6 = vector.load %arg3[%c192, %c0_5] : memref<320x128xbf16, #tpu.memory_space<vmem>>, vector<128x128xbf16>
    %c0_6 = arith.constant 0 : index
    %c0_7 = arith.constant 0 : index
    %7 = vector.load %arg4[%c0_6, %c0_7] : memref<8x128xf32, #tpu.memory_space<vmem>>, vector<1x128xf32>
    %c1 = arith.constant 1 : index
    %c0_8 = arith.constant 0 : index
    %8 = vector.load %arg4[%c1, %c0_8] : memref<8x128xf32, #tpu.memory_space<vmem>>, vector<1x128xf32>
    %c2 = arith.constant 2 : index
    %c0_9 = arith.constant 0 : index
    %9 = vector.load %arg4[%c2, %c0_9] : memref<8x128xf32, #tpu.memory_space<vmem>>, vector<1x128xf32>
    %cst = arith.constant dense<0.000000e+00> : vector<8x128xf32>
    %10 = tpu.matmul %3, %4, %cst {dimension_numbers = #tpu.dot_dimension_numbers<[1], [0], [0], [1], [0, 0, 1, 1], [], []>} : vector<8x64xbf16>, vector<64x128xbf16>, vector<8x128xf32> -> vector<8x128xf32>
    %11 = vector.broadcast %7 : vector<1x128xf32> to vector<8x128xf32>
    %12 = arith.addf %10, %11 : vector<8x128xf32>
    %cst_10 = arith.constant 0.000000e+00 : f32
    %13 = vector.broadcast %cst_10 : f32 to vector<8x128xf32>
    %14 = arith.maximumf %12, %13 : vector<8x128xf32>
    %15 = arith.truncf %14 : vector<8x128xf32> to vector<8x128xbf16>
    %cst_11 = arith.constant dense<0.000000e+00> : vector<8x128xf32>
    %16 = tpu.matmul %15, %5, %cst_11 {dimension_numbers = #tpu.dot_dimension_numbers<[1], [0], [0], [1], [0, 0, 1, 1], [], []>} : vector<8x128xbf16>, vector<128x128xbf16>, vector<8x128xf32> -> vector<8x128xf32>
    %17 = vector.broadcast %8 : vector<1x128xf32> to vector<8x128xf32>
    %18 = arith.addf %16, %17 : vector<8x128xf32>
    %cst_12 = arith.constant 0.000000e+00 : f32
    %19 = vector.broadcast %cst_12 : f32 to vector<8x128xf32>
    %20 = arith.maximumf %18, %19 : vector<8x128xf32>
    %21 = arith.truncf %20 : vector<8x128xf32> to vector<8x128xbf16>
    %cst_13 = arith.constant dense<0.000000e+00> : vector<8x128xf32>
    %22 = tpu.matmul %21, %6, %cst_13 {dimension_numbers = #tpu.dot_dimension_numbers<[1], [0], [0], [1], [0, 0, 1, 1], [], []>} : vector<8x128xbf16>, vector<128x128xbf16>, vector<8x128xf32> -> vector<8x128xf32>
    %23 = vector.broadcast %9 : vector<1x128xf32> to vector<8x128xf32>
    %24 = arith.addf %22, %23 : vector<8x128xf32>
    %cst_14 = arith.constant 0.000000e+00 : f32
    %25 = vector.broadcast %cst_14 : f32 to vector<8x128xf32>
    %26 = arith.maximumf %24, %25 : vector<8x128xf32>
    %c0_15 = arith.constant 0 : index
    %c0_16 = arith.constant 0 : index
    %27 = vector.load %arg6[%c0_15, %c0_16] : memref<1x128xf32, #tpu.memory_space<vmem>>, vector<1x128xf32>
    %cst_17 = arith.constant dense<0.000000e+00> : vector<128xf32>
    %28 = vector.multi_reduction <add>, %26, %cst_17 [0] : vector<8x128xf32> to vector<128xf32>
    %29 = vector.shape_cast %28 : vector<128xf32> to vector<1x128xf32>
    %30 = arith.addf %27, %29 : vector<1x128xf32>
    %c0_18 = arith.constant 0 : index
    %c0_19 = arith.constant 0 : index
    %31 = vector.load %arg6[%c0_18, %c0_19] : memref<1x128xf32, #tpu.memory_space<vmem>>, vector<1x128xf32>
    tpu.vector_store %arg6[%c0_18, %c0_19], %30 {strides = array<i32>} : memref<1x128xf32, #tpu.memory_space<vmem>>, vector<1x128xf32>,
    %c0_i32_20 = arith.constant 0 : i32
    %32 = arith.cmpi eq, %arg1, %c0_i32_20 : i32
    %33 = arith.extui %32 : i1 to i32
    %c0_i32_21 = arith.constant 0 : i32
    %34 = arith.cmpi ne, %33, %c0_i32_21 : i32
    scf.if %34 {
      %c0_22 = arith.constant 0 : index
      %c0_23 = arith.constant 0 : index
      %35 = vector.load %arg6[%c0_22, %c0_23] : memref<1x128xf32, #tpu.memory_space<vmem>>, vector<1x128xf32>
      %36 = vector.shape_cast %35 : vector<1x128xf32> to vector<1x1x128xf32>
      %cst_24 = arith.constant dense<0.000000e+00> : vector<1xf32>
      %37 = vector.multi_reduction <add>, %36, %cst_24 [1, 2] : vector<1x1x128xf32> to vector<1xf32>
      %38 = vector.shape_cast %37 : vector<1xf32> to vector<1x1x1xf32>
      %39 = vector.extract %38[0, 0, 0] : f32 from vector<1x1x1xf32>
      %c0_25 = arith.constant 0 : index
      %c0_26 = arith.constant 0 : index
      %40 = memref.load %arg5[%c0_25, %c0_26] : memref<1x1xf32, #tpu.memory_space<smem>>
      memref.store %39, %arg5[%c0_25, %c0_26] : memref<1x1xf32, #tpu.memory_space<smem>>
    } else {
    }
    return
  }
  func.func @transform_0(%arg0: i32, %arg1: i32) -> (i32, i32) {
    %c1_i32 = arith.constant 1 : i32
    %0 = arith.muli %arg0, %c1_i32 : i32
    %1 = arith.addi %0, %arg1 : i32
    %c0_i32 = arith.constant 0 : i32
    %c0_i32_0 = arith.constant 0 : i32
    return %1, %c0_i32 : i32, i32
  }
  func.func @transform_1(%arg0: i32, %arg1: i32) -> (i32, i32) {
    %c0_i32 = arith.constant 0 : i32
    %c0_i32_0 = arith.constant 0 : i32
    %c0_i32_1 = arith.constant 0 : i32
    return %c0_i32, %c0_i32_0 : i32, i32
  }
  func.func @transform_2(%arg0: i32, %arg1: i32) -> (i32, i32) {
    %c0_i32 = arith.constant 0 : i32
    %c0_i32_0 = arith.constant 0 : i32
    %c0_i32_1 = arith.constant 0 : i32
    return %c0_i32, %c0_i32_0 : i32, i32
  }
  func.func @transform_3(%arg0: i32, %arg1: i32) -> (i32, i32) {
    %c0_i32 = arith.constant 0 : i32
    %c0_i32_0 = arith.constant 0 : i32
    return %arg0, %c0_i32 : i32, i32
  }
}

</mosaic_0001>

<bundles_post_ra>
// kernel: tpu_custom_call.1
= control target key start
LH: loop header
LB: loop body
LE: loop exit
PB: predicated region body
PF: predicated region fallthrough
CT: control target
= control target key end

     0   :  { %8 = vsyncpa [#allocation4], 0  ;;  %s568_s0 = inlined_call_operand.hbm [shape: bf16[8,64], index: 0, kind: input, shape index: {}]   ;;  %s569_s1 = inlined_call_operand.hbm [shape: bf16[320,128], index: 1, kind: input, shape index: {}]   ;;  %s570_s2 = inlined_call_operand.hbm [shape: f32[8,128], index: 2, kind: input, shape index: {}]   ;;  %s571_s3 = inlined_call_operand.hbm [shape: f32[1,1], index: 3, kind: output, shape index: {}]  }
   0x1   :  { %9 = vsyncpa [#allocation7], 0  ;;  %s29_s14 = sshll.u32 %s569_s1, 4  ;;  %s30_s14 = int_to_ptr.hbm [resolvable:$true] %s29_s14 }
   0x2   :  { %10 = vsyncpa [#allocation5], 0  ;;  %s529_s15 = smov [#allocation6]   ;;  %s19_s19 = sshll.u32 %s568_s0, 4  ;;  %s20_s19 = int_to_ptr.hbm [resolvable:$true] %s19_s19 }
   0x3   :  { %s31_s16 = sshll.u32 %s529_s15, 4  ;;  %s530_s20 = smov 64   ;;  %s32_s16 = int_to_ptr.vmem [resolvable:$true] %s31_s16 }
   0x4   :  { %s531_s21 = smov 4   ;;  %s532_s22 = smov [#allocation3]  }
   0x5   :  { %37 = dma.hbm_to_vmem [thread:$0]  %s30_s14, 2560, %s32_s16, [#allocation7], %s530_s20, %s530_s20, %s531_s21  }
   0x6   :  { %s21_s23 = sshll.u32 %s532_s22, 4  ;;  %s43_s26 = sshll.u32 %s570_s2, 4  ;;  %s22_s23 = int_to_ptr.vmem [resolvable:$true] %s21_s23  ;;  %s44_s26 = int_to_ptr.hbm [resolvable:$true] %s43_s26 }
   0x7   :  { %24 = dma.hbm_to_vmem [thread:$0]  %s20_s19, 64, %s22_s23, [#allocation4]  }
   0x8   :  { %s533_s1 = smov [#allocation8]  }
   0x9   :  { %s45_s27 = sshll.u32 %s533_s1, 4  ;;  %s46_s27 = int_to_ptr.vmem [resolvable:$true] %s45_s27 }
   0xa   :  { %48 = dma.hbm_to_vmem [thread:$0]  %s44_s26, 128, %s46_s27, [#allocation7]  }
   0xb   :  { %523 = dma.done.wait [#allocation4], 64  }
   0xc   :  { %524 = vsyncadd [#allocation4], 4294967232 }
   0xd   :  { %525 = dma.done.wait [#allocation7], 2688  }
   0xe   :  { %526 = vsyncadd [#allocation7], 4294964608  ;;  %v410_v0 = vld [vmem:[#allocation6 + $0x18] sm:$0xff]  ;;  %v409_v2 = vld [vmem:[#allocation6 + $0x10] sm:$0xff]  ;;  %vm137_vm0 = vcmask 523264   ;;  %v534_v27 = vmov 0.0  }
   0xf   :  { %v418_v1 = vld [vmem:[#allocation6 + $0x58] sm:$0xff]  ;;  %145 = vmatpush.bf16.msra.mxu0 %v410_v0  ;;  %v417_v3 = vld [vmem:[#allocation6 + $0x50] sm:$0xff]  ;;  %v408_v4 = vld [vmem:[#allocation6 + $0x8] sm:$0xff]  ;;  %67 = vst [vmem:[#allocation2] sm:$0x1] %v534_v27  ;;  %vm296_vm1 = vcmask 1040384  }
  0x10   :  { %205 = vmatpush.bf16.msra.mxu1 %v418_v1  ;;  %v416_v5 = vld [vmem:[#allocation6 + $0x48] sm:$0xff]  ;;  %v407_v6 = vld [vmem:[#allocation6] sm:$0xff]  ;;  %v68_v8 = vld [vmem:[#allocation3] sm:$0xf]  ;;  %s314_s28 = sshll.u32 %s571_s3, 4  ;;  %s535_s30 = smov [#allocation9]   ;;  %s315_s28 = int_to_ptr.hbm [resolvable:$true] %s314_s28 }
  0x11   :  { %v415_v7 = vld [vmem:[#allocation6 + $0x40] sm:$0xff]  ;;  %v414_v9 = vld [vmem:[#allocation6 + $0x38] sm:$0xff]  ;;  %v413_v10 = vld [vmem:[#allocation6 + $0x30] sm:$0xff] }
  0x12   :  { %v412_v11 = vld [vmem:[#allocation6 + $0x28] sm:$0xff]  ;;  %v411_v12 = vld [vmem:[#allocation6 + $0x20] sm:$0xff]  ;;  %v426_v13 = vld [vmem:[#allocation6 + $0x98] sm:$0xff] }
  0x13   :  { %146 = vmatpush.bf16.msra.mxu0 %v409_v2  ;;  %269 = vmatpush.bf16.msra.mxu2 %v426_v13  ;;  %v425_v14 = vld [vmem:[#allocation6 + $0x90] sm:$0xff]  ;;  %v424_v15 = vld [vmem:[#allocation6 + $0x88] sm:$0xff]  ;;  %v423_v16 = vld [vmem:[#allocation6 + $0x80] sm:$0xff] }
  0x14   :  { %206 = vmatpush.bf16.msra.mxu1 %v417_v3  ;;  %v422_v17 = vld [vmem:[#allocation6 + $0x78] sm:$0xff]  ;;  %v421_v18 = vld [vmem:[#allocation6 + $0x70] sm:$0xff]  ;;  %v436_v19 = vld [vmem:[#allocation8] ss:$0 sm:$0xff] }
  0x15   :  { %v420_v25 = vld [vmem:[#allocation6 + $0x68] sm:$0xff]  ;;  %v419_v26 = vld [vmem:[#allocation6 + $0x60] sm:$0xff] }
  0x16   :  { %v437_v28 = vld [vmem:[#allocation8 + $0x1] ss:$0 sm:$0xff]  ;;  %v438_v34 = vld [vmem:[#allocation8 + $0x2] ss:$0 sm:$0xff]  ;;  %v283_v44 = vld [vmem:[#allocation2] sm:$0x1] }
  0x17   :  { %147 = vmatpush.bf16.msra.mxu0 %v408_v4  ;;  %270 = vmatpush.bf16.msra.mxu2 %v425_v14 }
  0x18   :  { %207 = vmatpush.bf16.msra.mxu1 %v416_v5 }
  0x1b   :  { %148 = vmatpush.bf16.msra.mxu0 %v407_v6  ;;  %271 = vmatpush.bf16.msra.mxu2 %v424_v15 }
  0x1c   :  { %208 = vmatpush.bf16.msra.mxu1 %v415_v7 }
  0x1e   :  { %342 = vmatmul.msk.bf16.vlgmr.msra.gmra.mxu0 %vm137_vm0, %v68_v8 }
  0x1f   :  { %272 = vmatpush.bf16.msra.mxu2 %v423_v16 }
  0x20   :  { %209 = vmatpush.bf16.msra.mxu1 %v414_v9 }
  0x23   :  { %273 = vmatpush.bf16.msra.mxu2 %v422_v17 }
  0x24   :  { %210 = vmatpush.bf16.msra.mxu1 %v413_v10 }
  0x27   :  { %274 = vmatpush.bf16.msra.mxu2 %v421_v18 }
  0x28   :  { %211 = vmatpush.bf16.msra.mxu1 %v412_v11 }
  0x2b   :  { %275 = vmatpush.bf16.msra.mxu2 %v420_v25 }
  0x2c   :  { %212 = vmatpush.bf16.msra.mxu1 %v411_v12 }
  0x2f   :  { %276 = vmatpush.bf16.msra.mxu2 %v419_v26 }
  0x9b   :  { %v150_v20 = vpop.f32.mrf.mxu0 }
  0x9c   :  { %v151_v21 = vadd.f32 %v436_v19, %v150_v20 }
  0x9e   :  { %v154_v22 = vmax.f32 %v151_v21, 0.0 }
  0xa0   :  { %v155_v23 = vpack.c.bf16 %v154_v22, %v154_v22 }
  0xa2   :  { %213 = vmatmul.bf16.vlgmr.msra.gmra.mxu1 %v155_v23 }
  0xa3   :  { %v152_v24 = vpop.f32.mrf.mxu0 }
 0x11f   :  { %v214_v29 = vpop.f32.mrf.mxu1 }
 0x120   :  { %v215_v30 = vadd.f32 %v437_v28, %v214_v29 }
 0x122   :  { %v218_v31 = vmax.f32 %v215_v30, 0.0 }
 0x124   :  { %v219_v32 = vpack.c.bf16 %v218_v31, %v218_v31 }
 0x126   :  { %277 = vmatmul.bf16.vlgmr.msra.gmra.mxu2 %v219_v32 }
 0x127   :  { %v216_v33 = vpop.f32.mrf.mxu1 }
 0x1a9   :  { %v278_v35 = vpop.f32.mrf.mxu2 }
 0x1aa   :  { %v279_v36 = vadd.f32 %v438_v34, %v278_v35 }
 0x1ac   :  { %v282_v37 = vmax.f32 %v279_v36, 0.0 }
 0x1ae   :  { %v284_v38 = vrot.slane %v282_v37, 4 }
 0x1b0   :  { %v285_v39 = vadd.f32 %v284_v38, %v282_v37 }
 0x1b1   :  { %v280_v40 = vpop.f32.mrf.mxu2 }
 0x1b2   :  { %v286_v41 = vrot.slane %v285_v39, 2 }
 0x1b4   :  { %v287_v42 = vadd.f32 %v286_v41, %v285_v39 }
 0x1b6   :  { %v288_v43 = vrot.slane %v287_v42, 1 }
 0x1b8   :  { %v289_v45 = vadd.f32 %v288_v43, %v287_v42 }
 0x1ba   :  { %v290_v46 = vadd.f32 %v289_v45, %v283_v44 }
 0x1bc   :  { %291 = vst [vmem:[#allocation2] sm:$0x1] %v290_v46 }
 0x1c3   :  { %v295_v47 = vld [vmem:[#allocation2] sm:$0x1] }
 0x1c4   :  { %v297_v48 = vsel %vm296_vm1, %v295_v47, 0.0 }
 0x1c5   :  { %298 = vadd.xlane.f32.xlu0 %v297_v48 }
 0x238   :  { %v299_v49 = vpop.xlane.xlu0 %298 }
 0x239   :  { %v300_v50 = vrot.slane %v299_v49, 4 }
 0x23b   :  { %v301_v51 = vadd.f32 %v300_v50, %v299_v49 }
 0x23d   :  { %v302_v52 = vrot.slane %v301_v51, 2 }
 0x23f   :  { %v303_v53 = vadd.f32 %v302_v52, %v301_v51 }
 0x241   :  { %v304_v54 = vrot.slane %v303_v53, 1 }
 0x243   :  { %v305_v55 = vadd.f32 %v304_v54, %v303_v53 }
 0x245   :  { %427 = vpush %v305_v55 }
 0x276   :  { %s428_s29 = spop %427 }
 0x277   :  { %308 = sst [smem:[#allocation9]] %s428_s29 }
 0x278   :  { %317 = dma.smem_to_hbm %s535_s30, 16, %s315_s28, [#allocation5]  }
 0x279   :  { %527 = dma.done.wait [#allocation5], 16  }
 0x27a   :  { %528 = vsyncadd [#allocation5], 4294967280 }
 0x27b   :  { %322 = sfence }
 0x27c   :  { %323 = vsyncpa [#allocation4], 1 }
 0x27d   :  { %324 = vsyncpa [#allocation7], 1 }
 0x27e   :  { %325 = vsyncpa [#allocation5], 1 }

</bundles_post_ra>
